<compile_context>
chip_gen: v7x
topology: tpu7x:2x2x1
jax: 0.10.0
libtpu: 0.0.40
codegen_flags: <defaults>
</compile_context>

<pallas_src>
import math
from functools import partial

import jax
import jax.numpy as jnp
from jax import lax
from jax.experimental import pallas as pl
from jax.experimental.pallas import tpu as pltpu


def _round_up(n, m):
    return ((n + m - 1) // m) * m


# ----------------------------------------------------------------------------
# Kernel: fused MLP + fused two-head matmul + two masked softmaxes
# ----------------------------------------------------------------------------
def fused_mlp_two_head_kernel(x_ref, w_ref, b_ref, out_ref, *, num_hidden, o0, o1):
    # x_ref  : (B_pad, P)                zero-padded, lane/sublane aligned input
    # w_ref  : (num_hidden + 1, P, P)    stacked zero-padded weights
    #                                    (slab `num_hidden` = concatenated heads)
    # b_ref  : (8, P)                    bias row `i` for layer i, zeros elsewhere
    # out_ref: (B_pad, P)                lane-dense output: head0 probs in
    #                                    lanes [0, o0), head1 in [o0, o0+o1), 0 elsewhere
    h = x_ref[...]

    # Hidden layers: Linear + ReLU.  (nn.Dropout(p=0) is the identity -> elided.)
    for layer in range(num_hidden):
        h = jnp.dot(h, w_ref[layer], preferred_element_type=jnp.float32)
        h = h + b_ref[layer : layer + 1, :]
        h = jnp.maximum(h, 0.0)

    # Fused heads: one matmul produces both heads' logits in the same 128-lane row.
    logits = jnp.dot(h, w_ref[num_hidden], preferred_element_type=jnp.float32)
    logits = logits + b_ref[num_hidden : num_hidden + 1, :]

    lane = lax.broadcasted_iota(jnp.int32, logits.shape, dimension=1)
    mask0 = lane < o0
    mask1 = jnp.logical_and(lane >= o0, lane < o0 + o1)
    neg = jnp.float32(-1e30)

    def masked_softmax(mask):
        l = jnp.where(mask, logits, neg)
        m = jnp.max(l, axis=-1, keepdims=True)
        e = jnp.where(mask, jnp.exp(l - m), 0.0)
        s = jnp.sum(e, axis=-1, keepdims=True)
        return e * pl.reciprocal(s, approx=True)

    # Disjoint lane masks -> simple add gives one lane-dense store.
    out_ref[...] = masked_softmax(mask0) + masked_softmax(mask1)


# ----------------------------------------------------------------------------
# Wrapper: packs params into lane-aligned slabs, pads batch, slices heads back.
# ----------------------------------------------------------------------------
def linear_model_forward(x, params):
    """x: (B, num_features, num_timesteps) -> (out_avpu (B,O0), out_crt (B,O1))."""
    w1, b1, w2, b2, wf0, bf0, wf1, bf1 = params
    o0 = wf0.shape[1]
    o1 = wf1.shape[1]

    B = x.shape[0]
    x_flat = x.reshape(B, -1).astype(jnp.float32)
    d_in = x_flat.shape[1]

    # Fuse the two heads into one weight / one bias.
    wf = jnp.concatenate([wf0, wf1], axis=1)   # (H, o0+o1)
    bf = jnp.concatenate([bf0, bf1], axis=1)   # (1, o0+o1)

    weights = [w1, w2, wf]
    biases = [b1, b2, bf]
    num_hidden = len(weights) - 1

    LANE, SUB = 128, 8
    # Common padded tile size so all layers share one stacked slab.
    all_dims = [d_in] + [w.shape[0] for w in weights] + [w.shape[1] for w in weights]
    P = max(_round_up(d, LANE) for d in all_dims)
    assert o0 + o1 <= P

    def pad_w(w):
        w = w.astype(jnp.float32)
        return jnp.pad(w, ((0, P - w.shape[0]), (0, P - w.shape[1])))

    w_slab = jnp.stack([pad_w(w) for w in weights])          # (L, P, P) -- 1 DMA

    b_slab = jnp.zeros((SUB, P), jnp.float32)                # (8, P)    -- 1 DMA
    for i, b in enumerate(biases):
        b_slab = b_slab.at[i, : b.shape[1]].set(b[0].astype(jnp.float32))

    B_pad = _round_up(max(B, 1), SUB)
    x_pad = jnp.pad(x_flat, ((0, B_pad - B), (0, P - d_in)))  # (B_pad, P) -- 1 DMA

    vmem = pl.BlockSpec(memory_space=pltpu.MemorySpace.VMEM)
    kernel = partial(fused_mlp_two_head_kernel, num_hidden=num_hidden, o0=o0, o1=o1)

    out = pl.pallas_call(
        kernel,
        out_shape=jax.ShapeDtypeStruct((B_pad, P), jnp.float32),
        in_specs=[vmem, vmem, vmem],
        out_specs=vmem,
    )(x_pad, w_slab, b_slab)

    # Slice the two heads back out of the lane-dense output.
    out_avpu = out[:B, :o0]
    out_crt = out[:B, o0 : o0 + o1]
    return out_avpu, out_crt


# ----------------------------------------------------------------------------
# Deterministic parameter init (mirrors the PyTorch __init__)
#   - xavier_uniform_ with gain = calculate_gain('sigmoid') = 1.0
#   - bias filled with 0.01
# TODO(synk): nn.Dropout(p=linear_dropout) with p=0 is the identity at inference;
#             no Pallas op is emitted for it.
# ----------------------------------------------------------------------------
def xavier_uniform(key, fan_in, fan_out, gain=1.0):
    limit = gain * math.sqrt(6.0 / (fan_in + fan_out))
    # stored as (in, out) so the kernel computes x @ W
    return jax.random.uniform(
        key, (fan_in, fan_out), minval=-limit, maxval=limit, dtype=jnp.float32
    )


def init_params(key, num_features, num_timesteps, hidden_dims, num_output=(4, 7)):
    keys = jax.random.split(key, len(hidden_dims) + 2)
    params = []
    in_dim = num_features * num_timesteps
    for i, hidden in enumerate(hidden_dims):
        w = xavier_uniform(keys[i], in_dim, hidden)
        b = jnp.full((1, hidden), 0.01, dtype=jnp.float32)
        params += [w, b]
        in_dim = hidden
    # fc0
    wf0 = xavier_uniform(keys[-2], in_dim, num_output[0])
    bf0 = jnp.full((1, num_output[0]), 0.01, dtype=jnp.float32)
    # fc1
    wf1 = xavier_uniform(keys[-1], in_dim, num_output[1])
    bf1 = jnp.full((1, num_output[1]), 0.01, dtype=jnp.float32)
    params += [wf0, bf0, wf1, bf1]
    return tuple(params)


# ----------------------------------------------------------------------------
# Pure-JAX reference (matches the PyTorch forward semantics)
# ----------------------------------------------------------------------------
def reference_forward(x, params):
    w1, b1, w2, b2, wf0, bf0, wf1, bf1 = params
    h = x.reshape(x.shape[0], -1)
    h = jnp.maximum(h @ w1 + b1, 0.0)
    h = jnp.maximum(h @ w2 + b2, 0.0)
    l0 = h @ wf0 + bf0
    l1 = h @ wf1 + bf1
    p0 = jax.nn.softmax(l0, axis=-1)
    p1 = jax.nn.softmax(l1, axis=-1)
    return p0, p1


if __name__ == "__main__":
    # Small deterministic config: batch=2, num_features=4, num_timesteps=8,
    # hidden_dims=[32, 32], heads of size 4 and 7.
    B, F, T = 2, 4, 8
    hidden_dims = [32, 32]
    num_output = (4, 7)

    key = jax.random.PRNGKey(0)
    k_x, k_p = jax.random.split(key)

    x = jax.random.normal(k_x, (B, F, T), dtype=jnp.float32)
    params = init_params(k_p, F, T, hidden_dims, num_output)

    out_avpu, out_crt = linear_model_forward(x, params)
    jax.block_until_ready((out_avpu, out_crt))

    assert out_avpu.shape == (B, num_output[0])
    assert out_crt.shape == (B, num_output[1])

    # Each softmax row sums to 1 (loose tol: approx reciprocal on the denominator).
    assert jnp.allclose(jnp.sum(out_avpu, axis=-1), 1.0, atol=5e-3)
    assert jnp.allclose(jnp.sum(out_crt, axis=-1), 1.0, atol=5e-3)

    # Match the pure-JAX reference of the PyTorch forward.
    ref0, ref1 = reference_forward(x, params)
    assert jnp.allclose(out_avpu, ref0, atol=2e-3, rtol=2e-2)
    assert jnp.allclose(out_crt, ref1, atol=2e-3, rtol=2e-2)

    print("KERNEL_OK")
</pallas_src>

<mosaic_0001>
module attributes {stable_mosaic.version = 11 : i64} {
  func.func @fused_mlp_two_head_kernel(%arg0: memref<8x128xf32, #tpu.memory_space<vmem>>, %arg1: memref<3x128x128xf32, #tpu.memory_space<vmem>>, %arg2: memref<8x128xf32, #tpu.memory_space<vmem>>, %arg3: memref<8x128xf32, #tpu.memory_space<vmem>>) attributes {dimension_semantics = [], scalar_prefetch = 0 : i64, scratch_operands = 0 : i64, tpu.core_type = #tpu.core_type<tc>} {
    %c0 = arith.constant 0 : index
    %c0_0 = arith.constant 0 : index
    %0 = vector.load %arg0[%c0, %c0_0] : memref<8x128xf32, #tpu.memory_space<vmem>>, vector<8x128xf32>
    %c0_1 = arith.constant 0 : index
    %c0_2 = arith.constant 0 : index
    %c0_3 = arith.constant 0 : index
    %1 = vector.load %arg1[%c0_1, %c0_2, %c0_3] : memref<3x128x128xf32, #tpu.memory_space<vmem>>, vector<1x128x128xf32>
    %2 = vector.shape_cast %1 : vector<1x128x128xf32> to vector<128x128xf32>
    %cst = arith.constant dense<0.000000e+00> : vector<8x128xf32>
    %3 = tpu.matmul %0, %2, %cst {dimension_numbers = #tpu.dot_dimension_numbers<[1], [0], [0], [1], [0, 0, 1, 1], [], []>} : vector<8x128xf32>, vector<128x128xf32>, vector<8x128xf32> -> vector<8x128xf32>
    %c0_4 = arith.constant 0 : index
    %c0_5 = arith.constant 0 : index
    %4 = vector.load %arg2[%c0_4, %c0_5] : memref<8x128xf32, #tpu.memory_space<vmem>>, vector<1x128xf32>
    %5 = vector.broadcast %4 : vector<1x128xf32> to vector<8x128xf32>
    %6 = arith.addf %3, %5 : vector<8x128xf32>
    %cst_6 = arith.constant 0.000000e+00 : f32
    %7 = vector.broadcast %cst_6 : f32 to vector<8x128xf32>
    %8 = arith.maximumf %6, %7 : vector<8x128xf32>
    %c1 = arith.constant 1 : index
    %c0_7 = arith.constant 0 : index
    %c0_8 = arith.constant 0 : index
    %9 = vector.load %arg1[%c1, %c0_7, %c0_8] : memref<3x128x128xf32, #tpu.memory_space<vmem>>, vector<1x128x128xf32>
    %10 = vector.shape_cast %9 : vector<1x128x128xf32> to vector<128x128xf32>
    %cst_9 = arith.constant dense<0.000000e+00> : vector<8x128xf32>
    %11 = tpu.matmul %8, %10, %cst_9 {dimension_numbers = #tpu.dot_dimension_numbers<[1], [0], [0], [1], [0, 0, 1, 1], [], []>} : vector<8x128xf32>, vector<128x128xf32>, vector<8x128xf32> -> vector<8x128xf32>
    %c1_10 = arith.constant 1 : index
    %c0_11 = arith.constant 0 : index
    %12 = vector.load %arg2[%c1_10, %c0_11] : memref<8x128xf32, #tpu.memory_space<vmem>>, vector<1x128xf32>
    %13 = vector.broadcast %12 : vector<1x128xf32> to vector<8x128xf32>
    %14 = arith.addf %11, %13 : vector<8x128xf32>
    %cst_12 = arith.constant 0.000000e+00 : f32
    %15 = vector.broadcast %cst_12 : f32 to vector<8x128xf32>
    %16 = arith.maximumf %14, %15 : vector<8x128xf32>
    %c2 = arith.constant 2 : index
    %c0_13 = arith.constant 0 : index
    %c0_14 = arith.constant 0 : index
    %17 = vector.load %arg1[%c2, %c0_13, %c0_14] : memref<3x128x128xf32, #tpu.memory_space<vmem>>, vector<1x128x128xf32>
    %18 = vector.shape_cast %17 : vector<1x128x128xf32> to vector<128x128xf32>
    %cst_15 = arith.constant dense<0.000000e+00> : vector<8x128xf32>
    %19 = tpu.matmul %16, %18, %cst_15 {dimension_numbers = #tpu.dot_dimension_numbers<[1], [0], [0], [1], [0, 0, 1, 1], [], []>} : vector<8x128xf32>, vector<128x128xf32>, vector<8x128xf32> -> vector<8x128xf32>
    %c2_16 = arith.constant 2 : index
    %c0_17 = arith.constant 0 : index
    %20 = vector.load %arg2[%c2_16, %c0_17] : memref<8x128xf32, #tpu.memory_space<vmem>>, vector<1x128xf32>
    %21 = vector.broadcast %20 : vector<1x128xf32> to vector<8x128xf32>
    %22 = arith.addf %19, %21 : vector<8x128xf32>
    %23 = tpu.iota {dimensions = array<i32: 1>} : vector<8x128xi32>
    %c4_i32 = arith.constant 4 : i32
    %24 = vector.broadcast %c4_i32 : i32 to vector<8x128xi32>
    %25 = arith.cmpi slt, %23, %24 : vector<8x128xi32>
    %c4_i32_18 = arith.constant 4 : i32
    %26 = vector.broadcast %c4_i32_18 : i32 to vector<8x128xi32>
    %27 = arith.cmpi sge, %23, %26 : vector<8x128xi32>
    %c11_i32 = arith.constant 11 : i32
    %28 = vector.broadcast %c11_i32 : i32 to vector<8x128xi32>
    %29 = arith.cmpi slt, %23, %28 : vector<8x128xi32>
    %30 = arith.andi %27, %29 : vector<8x128xi1>
    %cst_19 = arith.constant -1.000000e+30 : f32
    %31 = vector.broadcast %cst_19 : f32 to vector<8x128xf32>
    %32 = arith.select %25, %22, %31 : vector<8x128xi1>, vector<8x128xf32>
    %cst_20 = arith.constant dense<0xFF800000> : vector<8xf32>
    %33 = vector.multi_reduction <maximumf>, %32, %cst_20 [1] : vector<8x128xf32> to vector<8xf32>
    %34 = vector.shape_cast %33 : vector<8xf32> to vector<8x1xf32>
    %35 = vector.broadcast %34 : vector<8x1xf32> to vector<8x128xf32>
    %36 = arith.subf %32, %35 : vector<8x128xf32>
    %37 = math.exp %36 : vector<8x128xf32>
    %cst_21 = arith.constant 0.000000e+00 : f32
    %38 = vector.broadcast %cst_21 : f32 to vector<8x128xf32>
    %39 = arith.select %25, %37, %38 : vector<8x128xi1>, vector<8x128xf32>
    %cst_22 = arith.constant dense<0.000000e+00> : vector<8xf32>
    %40 = vector.multi_reduction <add>, %39, %cst_22 [1] : vector<8x128xf32> to vector<8xf32>
    %41 = vector.shape_cast %40 : vector<8xf32> to vector<8x1xf32>
    %42 = tpu.reciprocal %41 {approx = true} : vector<8x1xf32> -> vector<8x1xf32>
    %43 = vector.broadcast %42 : vector<8x1xf32> to vector<8x128xf32>
    %44 = arith.mulf %39, %43 : vector<8x128xf32>
    %cst_23 = arith.constant -1.000000e+30 : f32
    %45 = vector.broadcast %cst_23 : f32 to vector<8x128xf32>
    %46 = arith.select %30, %22, %45 : vector<8x128xi1>, vector<8x128xf32>
    %cst_24 = arith.constant dense<0xFF800000> : vector<8xf32>
    %47 = vector.multi_reduction <maximumf>, %46, %cst_24 [1] : vector<8x128xf32> to vector<8xf32>
    %48 = vector.shape_cast %47 : vector<8xf32> to vector<8x1xf32>
    %49 = vector.broadcast %48 : vector<8x1xf32> to vector<8x128xf32>
    %50 = arith.subf %46, %49 : vector<8x128xf32>
    %51 = math.exp %50 : vector<8x128xf32>
    %cst_25 = arith.constant 0.000000e+00 : f32
    %52 = vector.broadcast %cst_25 : f32 to vector<8x128xf32>
    %53 = arith.select %30, %51, %52 : vector<8x128xi1>, vector<8x128xf32>
    %cst_26 = arith.constant dense<0.000000e+00> : vector<8xf32>
    %54 = vector.multi_reduction <add>, %53, %cst_26 [1] : vector<8x128xf32> to vector<8xf32>
    %55 = vector.shape_cast %54 : vector<8xf32> to vector<8x1xf32>
    %56 = tpu.reciprocal %55 {approx = true} : vector<8x1xf32> -> vector<8x1xf32>
    %57 = vector.broadcast %56 : vector<8x1xf32> to vector<8x128xf32>
    %58 = arith.mulf %53, %57 : vector<8x128xf32>
    %59 = arith.addf %44, %58 : vector<8x128xf32>
    %c0_27 = arith.constant 0 : index
    %c0_28 = arith.constant 0 : index
    %60 = vector.load %arg3[%c0_27, %c0_28] : memref<8x128xf32, #tpu.memory_space<vmem>>, vector<8x128xf32>
    tpu.vector_store %arg3[%c0_27, %c0_28], %59 {strides = array<i32>} : memref<8x128xf32, #tpu.memory_space<vmem>>, vector<8x128xf32>,
    return
  }
}

</mosaic_0001>

<bundles_post_ra>
// kernel: tpu_custom_call.1
= control target key start
LH: loop header
LB: loop body
LE: loop exit
PB: predicated region body
PF: predicated region fallthrough
CT: control target
= control target key end

     0   :  { %8 = vsyncpa [#allocation3], 0  ;;  %s827_s0 = inlined_call_operand.hbm [shape: f32[8,128], index: 0, kind: input, shape index: {}]   ;;  %s828_s1 = inlined_call_operand.hbm [shape: f32[3,128,128], index: 1, kind: input, shape index: {}]   ;;  %s829_s2 = inlined_call_operand.hbm [shape: f32[8,128], index: 2, kind: input, shape index: {}]   ;;  %s830_s3 = inlined_call_operand.hbm [shape: f32[8,128], index: 3, kind: output, shape index: {}]  }
   0x1   :  { %9 = vsyncpa [#allocation6], 0 }
   0x2   :  { %10 = vsyncpa [#allocation4], 0  ;;  %s718_s12 = smov [#allocation5]   ;;  %s624_s16 = scalar_lea.hbm %s828_s1, 6144 }
   0x3   :  { %s26_s13 = sshll.u32 %s718_s12, 4  ;;  %p625_p0 = scmp.ne.s32.totalorder %s828_s1, %s624_s16  ;;  %s27_s13 = int_to_ptr.vmem [resolvable:$true] %s26_s13 }
   0x4   :  { %p628_p1 = scmp.lt.u32.totalorder %s624_s16, %s828_s1 }
   0x6   :  { %p630_p2 = pnand %p628_p1, %p625_p0 }
   0x8   :  { %633 = shalt.err (!%p630_p2)
}
   0x9   :  { %s634_s21 = scalar_lea.vmem %s27_s13, 6144  ;;  %p639_p4 = scmp.lt.s32.totalorder %s27_s13, %s27_s13 }
   0xa   :  { %p635_p3 = scmp.ne.s32.totalorder %s27_s13, %s634_s21  ;;  %p640_p5 = scmp.lt.s32.totalorder %s634_s21, %s634_s21 }
   0xc   :  { %p641_p6 = por %p640_p5, %p639_p4 }
   0xe   :  { %p642_p7 = pnand %p641_p6, %p635_p3 }
  0x10   :  { %645 = shalt.err (!%p642_p7)
}
  0x11   :  { %s719_s22 = smov 128   ;;  %s720_s23 = smov 8  }
  0x12   :  { %32 = dma.hbm_to_vmem [thread:$0]  %s828_s1, 6144, %s27_s13, [#allocation6], %s719_s22, %s719_s22, %s720_s23  }
  0x13   :  { %s721_s26 = smov [#allocation2]   ;;  %s722_s28 = smov [#allocation7]  }
  0x14   :  { %s17_s27 = sshll.u32 %s721_s26, 4  ;;  %s39_s29 = sshll.u32 %s722_s28, 4  ;;  %s18_s27 = int_to_ptr.vmem [resolvable:$true] %s17_s27  ;;  %s40_s29 = int_to_ptr.vmem [resolvable:$true] %s39_s29 }
  0x15   :  { %s646_s5 = scalar_lea.hbm %s827_s0, 128 }
  0x16   :  { %p647_p8 = scmp.ne.s32.totalorder %s827_s0, %s646_s5  ;;  %p650_p9 = scmp.lt.u32.totalorder %s646_s5, %s827_s0 }
  0x18   :  { %p652_p10 = pnand %p650_p9, %p647_p8 }
  0x1a   :  { %655 = shalt.err (!%p652_p10)
}
  0x1b   :  { %s656_s1 = scalar_lea.vmem %s18_s27, 128  ;;  %p661_p12 = scmp.lt.s32.totalorder %s18_s27, %s18_s27 }
  0x1c   :  { %p657_p11 = scmp.ne.s32.totalorder %s18_s27, %s656_s1  ;;  %p662_p13 = scmp.lt.s32.totalorder %s656_s1, %s656_s1 }
  0x1e   :  { %p663_p0 = por %p662_p13, %p661_p12 }
  0x20   :  { %p664_p1 = pnand %p663_p0, %p657_p11 }
  0x22   :  { %667 = shalt.err (!%p664_p1)
}
  0x23   :  { %20 = dma.hbm_to_vmem [thread:$0]  %s827_s0, 128, %s18_s27, [#allocation3]  }
  0x24   :  { %s668_s14 = scalar_lea.hbm %s829_s2, 128 }
  0x25   :  { %p669_p2 = scmp.ne.s32.totalorder %s829_s2, %s668_s14  ;;  %p672_p3 = scmp.lt.u32.totalorder %s668_s14, %s829_s2 }
  0x27   :  { %p674_p4 = pnand %p672_p3, %p669_p2 }
  0x29   :  { %677 = shalt.err (!%p674_p4)
}
  0x2a   :  { %s678_s19 = scalar_lea.vmem %s40_s29, 128  ;;  %p683_p6 = scmp.lt.s32.totalorder %s40_s29, %s40_s29 }
  0x2b   :  { %p679_p5 = scmp.ne.s32.totalorder %s40_s29, %s678_s19  ;;  %p684_p7 = scmp.lt.s32.totalorder %s678_s19, %s678_s19 }
  0x2d   :  { %p685_p8 = por %p684_p7, %p683_p6 }
  0x2f   :  { %p686_p9 = pnand %p685_p8, %p679_p5 }
  0x31   :  { %689 = shalt.err (!%p686_p9)
}
  0x32   :  { %42 = dma.hbm_to_vmem [thread:$0]  %s829_s2, 128, %s40_s29, [#allocation6]  }
  0x33   :  { %712 = dma.done.wait [#allocation3], 128  }
  0x34   :  { %713 = vsyncadd [#allocation3], 4294967168 }
  0x35   :  { %714 = dma.done.wait [#allocation6], 6272  }
  0x36   :  { %715 = vsyncadd [#allocation6], 4294961024  ;;  %v723_v0 = vmov 0.0|0.0   ;;  %vm724_vm0 = vmmov 0   ;;  %v725_v1 = vmov 0.0   ;;  %v53_v2 = vld [vmem:[#allocation5] sm:$0xff] }
  0x37   :  { %535 = vmatprep.subr.bf16.mxu0 %v723_v0  ;;  %462 = vmatprep.mubr.msk.f32.mxu0 %vm724_vm0, %v725_v1  ;;  %v54_v3 = vld [vmem:[#allocation5 + $0x8] sm:$0xff]  ;;  %v55_v4 = vld [vmem:[#allocation5 + $0x10] sm:$0xff]  ;;  %v56_v6 = vld [vmem:[#allocation5 + $0x18] sm:$0xff]  ;;  %s726_s2 = smov [#allocation8]  }
  0x38   :  { %559 = vmatprep.subr.bf16.mxu1 %v723_v0  ;;  %497 = vmatprep.mubr.msk.f32.mxu1 %vm724_vm0, %v725_v1  ;;  %v536_v5 = vpack.c.bf16 %v54_v3, %v53_v2  ;;  %v539_v7 = vpack.c.bf16 %v56_v6, %v55_v4  ;;  %v57_v8 = vld [vmem:[#allocation5 + $0x20] sm:$0xff]  ;;  %v58_v9 = vld [vmem:[#allocation5 + $0x28] sm:$0xff]  ;;  %v148_v12 = vld [vmem:[#allocation5 + $0x90] sm:$0xff]  ;;  %s366_s21 = sshll.u32 %s726_s2, 4  ;;  %s367_s21 = int_to_ptr.vmem [resolvable:$true] %s366_s21 }
  0x39   :  { %v146_v10 = vld [vmem:[#allocation5 + $0x80] sm:$0xff]  ;;  %v147_v11 = vld [vmem:[#allocation5 + $0x88] sm:$0xff]  ;;  %v149_v13 = vld [vmem:[#allocation5 + $0x98] sm:$0xff]  ;;  %v542_v14 = vpack.c.bf16 %v58_v9, %v57_v8  ;;  %s690_s22 = scalar_lea.vmem %s367_s21, 128  ;;  %p695_p11 = scmp.lt.s32.totalorder %s367_s21, %s367_s21 }
  0x3a   :  { %537 = vmatpush3.bf16.msra.mxu0 %v536_v5  ;;  %v560_v15 = vpack.c.bf16 %v147_v11, %v146_v10  ;;  %v59_v16 = vld [vmem:[#allocation5 + $0x30] sm:$0xff]  ;;  %v60_v17 = vld [vmem:[#allocation5 + $0x38] sm:$0xff]  ;;  %v563_v18 = vpack.c.bf16 %v149_v13, %v148_v12  ;;  %v150_v19 = vld [vmem:[#allocation5 + $0xa0] sm:$0xff]  ;;  %p691_p10 = scmp.ne.s32.totalorder %s367_s21, %s690_s22  ;;  %p696_p12 = scmp.lt.s32.totalorder %s690_s22, %s690_s22 }
  0x3b   :  { %538 = vmatprep.subr.bf16.mxu0 %v723_v0  ;;  %v151_v20 = vld [vmem:[#allocation5 + $0xa8] sm:$0xff]  ;;  %v545_v21 = vpack.c.bf16 %v60_v17, %v59_v16  ;;  %v61_v22 = vld [vmem:[#allocation5 + $0x40] sm:$0xff]  ;;  %v152_v25 = vld [vmem:[#allocation5 + $0xb0] sm:$0xff] }
  0x3c   :  { %561 = vmatpush3.bf16.msra.mxu1 %v560_v15  ;;  %v62_v23 = vld [vmem:[#allocation5 + $0x48] sm:$0xff]  ;;  %v566_v24 = vpack.c.bf16 %v151_v20, %v150_v19  ;;  %v153_v26 = vld [vmem:[#allocation5 + $0xb8] sm:$0xff]  ;;  %v63_v28 = vld [vmem:[#allocation5 + $0x50] sm:$0xff]  ;;  %p697_p13 = por %p696_p12, %p695_p11 }
  0x3d   :  { %562 = vmatprep.subr.bf16.mxu1 %v723_v0  ;;  %v548_v27 = vpack.c.bf16 %v62_v23, %v61_v22  ;;  %v64_v29 = vld [vmem:[#allocation5 + $0x58] sm:$0xff]  ;;  %v569_v30 = vpack.c.bf16 %v153_v26, %v152_v25  ;;  %v154_v31 = vld [vmem:[#allocation5 + $0xc0] sm:$0xff]  ;;  %v155_v32 = vld [vmem:[#allocation5 + $0xc8] sm:$0xff]  ;;  %v330_v22 = vlaneseq }
  0x3e   :  { %540 = vmatpush3.bf16.msra.mxu0 %v539_v7  ;;  %v551_v33 = vpack.c.bf16 %v64_v29, %v63_v28  ;;  %v65_v34 = vld [vmem:[#allocation5 + $0x60] sm:$0xff]  ;;  %v66_v35 = vld [vmem:[#allocation5 + $0x68] sm:$0xff]  ;;  %v572_v36 = vpack.c.bf16 %v155_v32, %v154_v31  ;;  %v156_v37 = vld [vmem:[#allocation5 + $0xd0] sm:$0xff]  ;;  %p698_p0 = pnand %p697_p13, %p691_p10 }
  0x3f   :  { %541 = vmatprep.subr.bf16.mxu0 %v723_v0  ;;  %v157_v38 = vld [vmem:[#allocation5 + $0xd8] sm:$0xff]  ;;  %v554_v39 = vpack.c.bf16 %v66_v35, %v65_v34  ;;  %v67_v40 = vld [vmem:[#allocation5 + $0x70] sm:$0xff]  ;;  %v158_v43 = vld [vmem:[#allocation5 + $0xe0] sm:$0xff]  ;;  %v331_v23 = vand.u32 127, %v330_v22 }
  0x40   :  { %564 = vmatpush3.bf16.msra.mxu1 %v563_v18  ;;  %v68_v41 = vld [vmem:[#allocation5 + $0x78] sm:$0xff]  ;;  %v575_v42 = vpack.c.bf16 %v157_v38, %v156_v37  ;;  %v159_v44 = vld [vmem:[#allocation5 + $0xe8] sm:$0xff]  ;;  %v160_v48 = vld [vmem:[#allocation5 + $0xf0] sm:$0xff] }
  0x41   :  { %565 = vmatprep.subr.bf16.mxu1 %v723_v0  ;;  %v557_v45 = vpack.c.bf16 %v68_v41, %v67_v40  ;;  %v578_v46 = vpack.c.bf16 %v159_v44, %v158_v43  ;;  %v52_v47 = vld [vmem:[#allocation2] sm:$0xff]  ;;  %v239_v51 = vld [vmem:[#allocation5 + $0x100] sm:$0xff]  ;;  %v240_v52 = vld [vmem:[#allocation5 + $0x108] sm:$0xff]  ;;  %vm332_vm1 = vcmp.lt.s32.totalorder %v331_v23, 4  ;;  %vm333_vm2 = vcmp.ge.s32.totalorder %v331_v23, 4 }
  0x42   :  { %543 = vmatpush3.bf16.msra.mxu0 %v542_v14  ;;  %v161_v49 = vld [vmem:[#allocation5 + $0xf8] sm:$0xff]  ;;  %v241_v53 = vld [vmem:[#allocation5 + $0x110] sm:$0xff]  ;;  %v584_v54 = vpack.c.bf16 %v240_v52, %v239_v51  ;;  %v243_v57 = vld [vmem:[#allocation5 + $0x120] sm:$0xff]  ;;  %vm334_vm3 = vcmp.lt.s32.totalorder %v331_v23, 11 }
  0x43   :  { %544 = vmatprep.subr.bf16.mxu0 %v723_v0  ;;  %v581_v50 = vpack.c.bf16 %v161_v49, %v160_v48  ;;  %v242_v55 = vld [vmem:[#allocation5 + $0x118] sm:$0xff]  ;;  %v244_v58 = vld [vmem:[#allocation5 + $0x128] sm:$0xff]  ;;  %v245_v60 = vld [vmem:[#allocation5 + $0x130] sm:$0xff] }
  0x44   :  { %567 = vmatpush3.bf16.msra.mxu1 %v566_v24  ;;  %v587_v56 = vpack.c.bf16 %v242_v55, %v241_v53  ;;  %v590_v59 = vpack.c.bf16 %v244_v58, %v243_v57  ;;  %v246_v61 = vld [vmem:[#allocation5 + $0x138] sm:$0xff]  ;;  %v247_v63 = vld [vmem:[#allocation5 + $0x140] sm:$0xff]  ;;  %v249_v3 = vld [vmem:[#allocation5 + $0x150] sm:$0xff] }
  0x45   :  { %568 = vmatprep.subr.bf16.mxu1 %v723_v0  ;;  %v593_v62 = vpack.c.bf16 %v246_v61, %v245_v60  ;;  %v250_v4 = vld [vmem:[#allocation5 + $0x158] sm:$0xff]  ;;  %v251_v6 = vld [vmem:[#allocation5 + $0x160] sm:$0xff]  ;;  %v252_v7 = vld [vmem:[#allocation5 + $0x168] sm:$0xff] }
  0x46   :  { %546 = vmatpush3.bf16.msra.mxu0 %v545_v21  ;;  %v599_v5 = vpack.c.bf16 %v250_v4, %v249_v3  ;;  %v602_v8 = vpack.c.bf16 %v252_v7, %v251_v6  ;;  %v376_v9 = vld [vmem:[#allocation7] ss:$0 sm:$0xff]  ;;  %v253_v14 = vld [vmem:[#allocation5 + $0x170] sm:$0xff]  ;;  %v254_v15 = vld [vmem:[#allocation5 + $0x178] sm:$0xff] }
  0x47   :  { %547 = vmatprep.subr.bf16.mxu0 %v723_v0  ;;  %v605_v16 = vpack.c.bf16 %v254_v15, %v253_v14  ;;  %v377_v17 = vld [vmem:[#allocation7 + $0x1] ss:$0 sm:$0xff]  ;;  %v378_v24 = vld [vmem:[#allocation7 + $0x2] ss:$0 sm:$0xff]  ;;  %vm335_vm4 = vmand %vm333_vm2, %vm334_vm3 }
  0x48   :  { %570 = vmatpush3.bf16.msra.mxu1 %v569_v30 }
  0x49   :  { %571 = vmatprep.subr.bf16.mxu1 %v723_v0 }
  0x4a   :  { %549 = vmatpush3.bf16.msra.mxu0 %v548_v27 }
  0x4b   :  { %550 = vmatprep.subr.bf16.mxu0 %v723_v0 }
  0x4c   :  { %573 = vmatpush3.bf16.msra.mxu1 %v572_v36 }
  0x4d   :  { %574 = vmatprep.subr.bf16.mxu1 %v723_v0 }
  0x4e   :  { %552 = vmatpush3.bf16.msra.mxu0 %v551_v33 }
  0x4f   :  { %553 = vmatprep.subr.bf16.mxu0 %v723_v0 }
  0x50   :  { %576 = vmatpush3.bf16.msra.mxu1 %v575_v42 }
  0x51   :  { %577 = vmatprep.subr.bf16.mxu1 %v723_v0 }
  0x52   :  { %555 = vmatpush3.bf16.msra.mxu0 %v554_v39 }
  0x53   :  { %556 = vmatprep.subr.bf16.mxu0 %v723_v0 }
  0x54   :  { %579 = vmatpush3.bf16.msra.mxu1 %v578_v46 }
  0x55   :  { %580 = vmatprep.subr.bf16.mxu1 %v723_v0 }
  0x56   :  { %558 = vmatpush3.bf16.msra.mxu0 %v557_v45 }
  0x57   :  { %583 = vmatprep.subr.bf16.mxu0 %v723_v0 }
  0x58   :  { %582 = vmatpush3.bf16.msra.mxu1 %v581_v50 }
  0x59   :  { %463 = vmatmul.mubr.f32.vlgmr.msra.gmra.mrb[0].mxu0 %v52_v47 }
  0x5a   :  { %532 = vmatprep.mubr.msk.f32.mxu0 %vm724_vm0, %v725_v1  ;;  %585 = vmatpush3.bf16.msra.mxu0 %v584_v54  ;;  %v248_v1 = vld [vmem:[#allocation5 + $0x148] sm:$0xff] }
  0x5b   :  { %586 = vmatprep.subr.bf16.mxu0 %v723_v0  ;;  %v596_v2 = vpack.c.bf16 %v248_v1, %v247_v63 }
  0x5e   :  { %588 = vmatpush3.bf16.msra.mxu0 %v587_v56 }
  0x5f   :  { %589 = vmatprep.subr.bf16.mxu0 %v723_v0 }
  0x62   :  { %591 = vmatpush3.bf16.msra.mxu0 %v590_v59 }
  0x63   :  { %592 = vmatprep.subr.bf16.mxu0 %v723_v0 }
  0x66   :  { %594 = vmatpush3.bf16.msra.mxu0 %v593_v62 }
  0x67   :  { %595 = vmatprep.subr.bf16.mxu0 %v723_v0 }
  0x6a   :  { %597 = vmatpush3.bf16.msra.mxu0 %v596_v2 }
  0x6b   :  { %598 = vmatprep.subr.bf16.mxu0 %v723_v0 }
  0x6e   :  { %600 = vmatpush3.bf16.msra.mxu0 %v599_v5 }
  0x6f   :  { %601 = vmatprep.subr.bf16.mxu0 %v723_v0 }
  0x72   :  { %603 = vmatpush3.bf16.msra.mxu0 %v602_v8 }
  0x73   :  { %604 = vmatprep.subr.bf16.mxu0 %v723_v0 }
  0x76   :  { %606 = vmatpush3.bf16.msra.mxu0 %v605_v16 }
 0x12c   :  { %v140_v10 = vpop.f32.mrb[0].mxu0 }
 0x12d   :  { %v141_v11 = vadd.f32 %v376_v9, %v140_v10  ;;  %v464_v12 = vpop.f32.mrb[1].mxu0 }
 0x12f   :  { %v144_v13 = vmax.f32 %v141_v11, 0.0 }
 0x131   :  { %498 = vmatmul.mubr.f32.vlgmr.msra.gmra.mrb[0].mxu1 %v144_v13 }
 0x204   :  { %v233_v18 = vpop.f32.mrb[0].mxu1 }
 0x205   :  { %v234_v19 = vadd.f32 %v377_v17, %v233_v18  ;;  %v499_v20 = vpop.f32.mrb[1].mxu1 }
 0x207   :  { %v237_v21 = vmax.f32 %v234_v19, 0.0 }
 0x209   :  { %533 = vmatmul.mubr.f32.vlgmr.msra.gmra.mrb[2].mxu0 %v237_v21 }
 0x2dc   :  { %v326_v0 = vpop.f32.mrb[2].mxu0 }
 0x2dd   :  { %v327_v25 = vadd.f32 %v378_v24, %v326_v0  ;;  %v534_v26 = vpop.f32.mrb[3].mxu0 }
 0x2df   :  { %v336_v27 = vsel %vm332_vm1, %v327_v25, -1e+30  ;;  %v347_v28 = vsel %vm335_vm4, %v327_v25, -1e+30 }
 0x2e0   :  { %337 = vmax.xlane.f32.xlu0 %v336_v27 }
 0x2e4   :  { %348 = vmax.xlane.f32.xlu0 %v347_v28 }
 0x36d   :  { %v338_v29 = vpop.xlane.xlu0 %337 }
 0x36e   :  { %v339_v30 = vsub.f32 %v336_v27, %v338_v29 }
 0x370   :  { %v340_v31 = vmul.f32 1.442695, %v339_v30 }
 0x371   :  { %v349_v32 = vpop.xlane.xlu0 %348 }
 0x372   :  { %616 = vpow2.f32 %v340_v31  ;;  %v350_v33 = vsub.f32 %v347_v28, %v349_v32 }
 0x374   :  { %v351_v34 = vmul.f32 1.442695, %v350_v33 }
 0x376   :  { %618 = vpow2.f32 %v351_v34 }
 0x37c   :  { %v617_v35 = vpop.eup %616 }
 0x37d   :  { %v342_v36 = vsel %vm332_vm1, %v617_v35, 0.0 }
 0x37e   :  { %343 = vadd.xlane.f32.xlu1 %v342_v36 }
 0x380   :  { %v619_v37 = vpop.eup %618 }
 0x381   :  { %v353_v38 = vsel %vm335_vm4, %v619_v37, 0.0 }
 0x382   :  { %354 = vadd.xlane.f32.xlu1 %v353_v38 }
 0x40b   :  { %v344_v39 = vpop.xlane.xlu1 %343 }
 0x40c   :  { %620 = vrcp.f32 %v344_v39 }
 0x40f   :  { %v355_v40 = vpop.xlane.xlu1 %354 }
 0x410   :  { %622 = vrcp.f32 %v355_v40 }
 0x416   :  { %v621_v41 = vpop.eup %620 }
 0x417   :  { %v346_v43 = vmul.f32 %v621_v41, %v342_v36 }
 0x41a   :  { %v623_v42 = vpop.eup %622 }
 0x41b   :  { %v357_v44 = vmul.f32 %v623_v42, %v353_v38 }
 0x41d   :  { %v358_v45 = vadd.f32 %v357_v44, %v346_v43 }
 0x41f   :  { %359 = vst [vmem:[#allocation8] sm:$0xff] %v358_v45 }
 0x420   :  { %701 = shalt.err (!%p698_p0)
}
 0x421   :  { %s702_s25 = scalar_lea.hbm %s830_s3, 128 }
 0x422   :  { %p703_p1 = scmp.ne.s32.totalorder %s830_s3, %s702_s25  ;;  %p706_p2 = scmp.lt.u32.totalorder %s702_s25, %s830_s3 }
 0x424   :  { %p708_p3 = pnand %p706_p2, %p703_p1 }
 0x426   :  { %711 = shalt.err (!%p708_p3)
}
 0x427   :  { %369 = dma.vmem_to_hbm [thread:$0]  %s367_s21, 128, %s830_s3, [#allocation4]  }
 0x428   :  { %716 = dma.done.wait [#allocation4], 128  }
 0x429   :  { %717 = vsyncadd [#allocation4], 4294967168 }
 0x42a   :  { %373 = vsyncpa [#allocation3], 1 }
 0x42b   :  { %374 = vsyncpa [#allocation6], 1 }
 0x42c   :  { %375 = vsyncpa [#allocation4], 1 }

</bundles_post_ra>
